<compile_context>
chip_gen: v7x
topology: tpu7x:2x2x1
jax: 0.10.0
libtpu: 0.0.40
codegen_flags: <defaults>
</compile_context>

<pallas_src>
import jax
import jax.numpy as jnp
from jax.experimental import pallas as pl
from jax.experimental.pallas import tpu as pltpu


def _round_up(x, m):
    return ((x + m - 1) // m) * m


def _make_kernel(num_hidden):
    """Kernel: relu(onehot @ tbl0) -> num_hidden x [Linear+ReLU] -> Linear."""

    def kernel(idx_ref, tbl0_ref, *refs):
        # refs = (w_h0, b_h0, ..., w_h{k-1}, b_h{k-1}, w_out, b_out, out_ref)
        out_ref = refs[-1]
        wrefs = refs[:-1]
        tb = out_ref.shape[0]
        n_type = tbl0_ref.shape[0]
        cdt = tbl0_ref.dtype  # matmul operand dtype (f32 or bf16)

        # In-kernel one-hot: iota-compare against the int ids (VPU only).
        ids = idx_ref[...]                                            # (tb, 1) i32
        iota = jax.lax.broadcasted_iota(jnp.int32, (tb, n_type), 1)   # (tb, n_type)
        onehot = (iota == ids).astype(cdt)

        # Embedding + Linear0 + bias0 pre-folded into tbl0 -> single matmul + ReLU.
        h = jnp.dot(onehot, tbl0_ref[...], preferred_element_type=jnp.float32)
        h = jnp.maximum(h, 0.0)

        # Hidden Linear + ReLU blocks (bias/ReLU stay in f32 accumulator).
        for i in range(num_hidden):
            w = wrefs[2 * i][...]
            b = wrefs[2 * i + 1][...]
            h = jnp.dot(h.astype(cdt), w, preferred_element_type=jnp.float32) + b
            h = jnp.maximum(h, 0.0)

        # Final Linear, no activation.
        w = wrefs[2 * num_hidden][...]
        b = wrefs[2 * num_hidden + 1][...]
        out = jnp.dot(h.astype(cdt), w, preferred_element_type=jnp.float32) + b
        out_ref[...] = out.astype(out_ref.dtype)

    return kernel


def class_condition_embedding(idx, emb_tbl, linears, *, block_b=256,
                              matmul_dtype=jnp.float32):
    """
    idx:      (B,) integer class ids.
    emb_tbl:  (n_type, n_emb) f32 embedding table.
    linears:  list of (W, b) pairs, W as (in, out) (== PyTorch weight.T),
              b as (out,).  len(linears) == n_layers + 1.
    Returns:  (B, n_features) float32.
    """
    B = idx.shape[0]
    w0, b0 = linears[0]
    out_features = linears[-1][0].shape[1]

    # Algebraic fold: Embedding followed by Linear0(+bias) is exactly a row
    # lookup into (emb_tbl @ W0 + b0); precompute it once (constant-folds
    # under jit since all operands are parameters).
    tbl0 = (emb_tbl.astype(jnp.float32) @ w0.astype(jnp.float32)
            + b0.reshape(1, -1).astype(jnp.float32)).astype(matmul_dtype)

    hidden = [(w.astype(matmul_dtype), b.reshape(1, -1).astype(jnp.float32))
              for (w, b) in linears[1:-1]]
    w_out = linears[-1][0].astype(matmul_dtype)
    b_out = linears[-1][1].reshape(1, -1).astype(jnp.float32)

    # Batch tiling: pad B to a multiple of the batch block (>= 8 sublanes).
    tb = min(block_b, _round_up(B, 8))
    b_pad = _round_up(B, tb)
    idx2d = jnp.zeros((b_pad, 1), jnp.int32).at[:B, 0].set(idx.astype(jnp.int32))

    def resident(shape):
        # Full-array block, same block index every grid step -> stays in VMEM.
        return pl.BlockSpec(shape, lambda i: (0, 0))

    in_specs = [pl.BlockSpec((tb, 1), lambda i: (i, 0)),   # idx, blocked on batch
                resident(tbl0.shape)]
    args = [idx2d, tbl0]
    for (w, b) in hidden:
        in_specs += [resident(w.shape), resident(b.shape)]
        args += [w, b]
    in_specs += [resident(w_out.shape), resident(b_out.shape)]
    args += [w_out, b_out]

    out = pl.pallas_call(
        _make_kernel(len(hidden)),
        out_shape=jax.ShapeDtypeStruct((b_pad, out_features), jnp.float32),
        grid=(b_pad // tb,),
        in_specs=in_specs,
        out_specs=pl.BlockSpec((tb, out_features), lambda i: (i, 0)),
        compiler_params=pltpu.CompilerParams(
            dimension_semantics=("parallel",)),
    )(*args)
    return out[:B]


def reference_forward(idx, emb_tbl, linears):
    x = emb_tbl[idx]
    for (w, b) in linears[:-1]:
        x = jnp.maximum(x @ w + b.reshape(1, -1), 0.0)
    w, b = linears[-1]
    return x @ w + b.reshape(1, -1)


if __name__ == "__main__":
    # Module hyperparameters (small, consistent with the PyTorch __init__).
    n_type = 4        # number of classes
    n_emb = 16        # embedding dim
    n_features = 32   # hidden / output dim
    n_layers = 2      # -> n_layers + 1 = 3 Linear layers total
    batch = 8

    key = jax.random.PRNGKey(0)
    keys = jax.random.split(key, 2 + 2 * (n_layers + 1))

    idx = jax.random.randint(keys[0], (batch,), 0, n_type, dtype=jnp.int32)
    emb_tbl = jax.random.normal(keys[1], (n_type, n_emb), jnp.float32)

    dims = ([(n_emb, n_features)]
            + [(n_features, n_features)] * (n_layers - 1)
            + [(n_features, n_features)])
    linears = []
    for li, (din, dout) in enumerate(dims):
        kw, kb = keys[2 + 2 * li], keys[3 + 2 * li]
        w = jax.random.normal(kw, (din, dout), jnp.float32) * 0.1
        b = jax.random.normal(kb, (dout,), jnp.float32) * 0.1
        linears.append((w, b))

    out = class_condition_embedding(idx, emb_tbl, linears)
    out = jax.block_until_ready(out)

    ref = reference_forward(idx, emb_tbl, linears)
    assert out.shape == (batch, n_features)
    assert jnp.allclose(out, ref, atol=1e-4, rtol=1e-4), \
        float(jnp.max(jnp.abs(out - ref)))

    print("KERNEL_OK")
</pallas_src>

<mosaic_0001>
module attributes {stable_mosaic.version = 11 : i64} {
  func.func @kernel(%arg0: i32, %arg1: memref<8x1xi32, #tpu.memory_space<vmem>>, %arg2: memref<4x32xf32, #tpu.memory_space<vmem>>, %arg3: memref<32x32xf32, #tpu.memory_space<vmem>>, %arg4: memref<1x32xf32, #tpu.memory_space<vmem>>, %arg5: memref<32x32xf32, #tpu.memory_space<vmem>>, %arg6: memref<1x32xf32, #tpu.memory_space<vmem>>, %arg7: memref<8x32xf32, #tpu.memory_space<vmem>>) attributes {dimension_semantics = [#tpu.dimension_semantics<parallel>], iteration_bounds = array<i64: 1>, scalar_prefetch = 0 : i64, scratch_operands = 0 : i64, tpu.core_type = #tpu.core_type<tc>, window_params = [{transform_indices = @transform_0, window_bounds = array<i64: 8, 1>}, {pipeline_mode = #tpu.pipeline_mode<synchronous>, transform_indices = @transform_1, window_bounds = array<i64: 4, 32>}, {pipeline_mode = #tpu.pipeline_mode<synchronous>, transform_indices = @transform_2, window_bounds = array<i64: 32, 32>}, {pipeline_mode = #tpu.pipeline_mode<synchronous>, transform_indices = @transform_3, window_bounds = array<i64: 1, 32>}, {pipeline_mode = #tpu.pipeline_mode<synchronous>, transform_indices = @transform_4, window_bounds = array<i64: 32, 32>}, {pipeline_mode = #tpu.pipeline_mode<synchronous>, transform_indices = @transform_5, window_bounds = array<i64: 1, 32>}, {transform_indices = @transform_6, window_bounds = array<i64: 8, 32>}]} {
    %c0 = arith.constant 0 : index
    %c0_0 = arith.constant 0 : index
    %0 = vector.load %arg1[%c0, %c0_0] : memref<8x1xi32, #tpu.memory_space<vmem>>, vector<8x1xi32>
    %1 = tpu.iota {dimensions = array<i32: 1>} : vector<8x4xi32>
    %2 = vector.broadcast %0 : vector<8x1xi32> to vector<8x4xi32>
    %3 = arith.cmpi eq, %1, %2 : vector<8x4xi32>
    %4 = arith.extui %3 : vector<8x4xi1> to vector<8x4xi32>
    %5 = arith.sitofp %4 : vector<8x4xi32> to vector<8x4xf32>
    %c0_1 = arith.constant 0 : index
    %c0_2 = arith.constant 0 : index
    %6 = vector.load %arg2[%c0_1, %c0_2] : memref<4x32xf32, #tpu.memory_space<vmem>>, vector<4x32xf32>
    %cst = arith.constant dense<0.000000e+00> : vector<8x32xf32>
    %7 = tpu.matmul %5, %6, %cst {dimension_numbers = #tpu.dot_dimension_numbers<[1], [0], [0], [1], [0, 0, 1, 1], [], []>} : vector<8x4xf32>, vector<4x32xf32>, vector<8x32xf32> -> vector<8x32xf32>
    %cst_3 = arith.constant 0.000000e+00 : f32
    %8 = vector.broadcast %cst_3 : f32 to vector<8x32xf32>
    %9 = arith.maximumf %7, %8 : vector<8x32xf32>
    %c0_4 = arith.constant 0 : index
    %c0_5 = arith.constant 0 : index
    %10 = vector.load %arg3[%c0_4, %c0_5] : memref<32x32xf32, #tpu.memory_space<vmem>>, vector<32x32xf32>
    %c0_6 = arith.constant 0 : index
    %c0_7 = arith.constant 0 : index
    %11 = vector.load %arg4[%c0_6, %c0_7] : memref<1x32xf32, #tpu.memory_space<vmem>>, vector<1x32xf32>
    %cst_8 = arith.constant dense<0.000000e+00> : vector<8x32xf32>
    %12 = tpu.matmul %9, %10, %cst_8 {dimension_numbers = #tpu.dot_dimension_numbers<[1], [0], [0], [1], [0, 0, 1, 1], [], []>} : vector<8x32xf32>, vector<32x32xf32>, vector<8x32xf32> -> vector<8x32xf32>
    %13 = vector.broadcast %11 : vector<1x32xf32> to vector<8x32xf32>
    %14 = arith.addf %12, %13 : vector<8x32xf32>
    %cst_9 = arith.constant 0.000000e+00 : f32
    %15 = vector.broadcast %cst_9 : f32 to vector<8x32xf32>
    %16 = arith.maximumf %14, %15 : vector<8x32xf32>
    %c0_10 = arith.constant 0 : index
    %c0_11 = arith.constant 0 : index
    %17 = vector.load %arg5[%c0_10, %c0_11] : memref<32x32xf32, #tpu.memory_space<vmem>>, vector<32x32xf32>
    %c0_12 = arith.constant 0 : index
    %c0_13 = arith.constant 0 : index
    %18 = vector.load %arg6[%c0_12, %c0_13] : memref<1x32xf32, #tpu.memory_space<vmem>>, vector<1x32xf32>
    %cst_14 = arith.constant dense<0.000000e+00> : vector<8x32xf32>
    %19 = tpu.matmul %16, %17, %cst_14 {dimension_numbers = #tpu.dot_dimension_numbers<[1], [0], [0], [1], [0, 0, 1, 1], [], []>} : vector<8x32xf32>, vector<32x32xf32>, vector<8x32xf32> -> vector<8x32xf32>
    %20 = vector.broadcast %18 : vector<1x32xf32> to vector<8x32xf32>
    %21 = arith.addf %19, %20 : vector<8x32xf32>
    %c0_15 = arith.constant 0 : index
    %c0_16 = arith.constant 0 : index
    %22 = vector.load %arg7[%c0_15, %c0_16] : memref<8x32xf32, #tpu.memory_space<vmem>>, vector<8x32xf32>
    tpu.vector_store %arg7[%c0_15, %c0_16], %21 {strides = array<i32>} : memref<8x32xf32, #tpu.memory_space<vmem>>, vector<8x32xf32>,
    return
  }
  func.func @transform_0(%arg0: i32) -> (i32, i32) {
    %c0_i32 = arith.constant 0 : i32
    %c0_i32_0 = arith.constant 0 : i32
    return %arg0, %c0_i32 : i32, i32
  }
  func.func @transform_1(%arg0: i32) -> (i32, i32) {
    %c0_i32 = arith.constant 0 : i32
    %c0_i32_0 = arith.constant 0 : i32
    %c0_i32_1 = arith.constant 0 : i32
    return %c0_i32, %c0_i32_0 : i32, i32
  }
  func.func @transform_2(%arg0: i32) -> (i32, i32) {
    %c0_i32 = arith.constant 0 : i32
    %c0_i32_0 = arith.constant 0 : i32
    %c0_i32_1 = arith.constant 0 : i32
    return %c0_i32, %c0_i32_0 : i32, i32
  }
  func.func @transform_3(%arg0: i32) -> (i32, i32) {
    %c0_i32 = arith.constant 0 : i32
    %c0_i32_0 = arith.constant 0 : i32
    %c0_i32_1 = arith.constant 0 : i32
    return %c0_i32, %c0_i32_0 : i32, i32
  }
  func.func @transform_4(%arg0: i32) -> (i32, i32) {
    %c0_i32 = arith.constant 0 : i32
    %c0_i32_0 = arith.constant 0 : i32
    %c0_i32_1 = arith.constant 0 : i32
    return %c0_i32, %c0_i32_0 : i32, i32
  }
  func.func @transform_5(%arg0: i32) -> (i32, i32) {
    %c0_i32 = arith.constant 0 : i32
    %c0_i32_0 = arith.constant 0 : i32
    %c0_i32_1 = arith.constant 0 : i32
    return %c0_i32, %c0_i32_0 : i32, i32
  }
  func.func @transform_6(%arg0: i32) -> (i32, i32) {
    %c0_i32 = arith.constant 0 : i32
    %c0_i32_0 = arith.constant 0 : i32
    return %arg0, %c0_i32 : i32, i32
  }
}

</mosaic_0001>

<bundles_post_ra>
// kernel: tpu_custom_call.1
= control target key start
LH: loop header
LB: loop body
LE: loop exit
PB: predicated region body
PF: predicated region fallthrough
CT: control target
= control target key end

     0   :  { %11 = vsyncpa [#allocation3], 0  ;;  %s566_s0 = inlined_call_operand.vmem [shape: s32[8,1], index: 0, kind: input, shape index: {}]   ;;  %s567_s1 = inlined_call_operand.vmem [shape: f32[4,32], index: 1, kind: input, shape index: {}]   ;;  %s568_s2 = inlined_call_operand.hbm [shape: f32[32,32], index: 2, kind: input, shape index: {}]   ;;  %s569_s3 = inlined_call_operand.vmem [shape: f32[1,32], index: 3, kind: input, shape index: {}]   ;;  %s570_s4 = inlined_call_operand.hbm [shape: f32[32,32], index: 4, kind: input, shape index: {}]   ;;  %s571_s5 = inlined_call_operand.vmem [shape: f32[1,32], index: 5, kind: input, shape index: {}]   ;;  %s572_s6 = inlined_call_operand.hbm [shape: f32[8,32], index: 6, kind: output, shape index: {}]  }
   0x1   :  { %12 = vsyncpa [#allocation6], 0 }
   0x2   :  { %13 = vsyncpa [#allocation4], 0  ;;  %s468_s21 = smov [#allocation2]   ;;  %s396_s25 = scalar_lea.hbm %s568_s2, 512 }
   0x3   :  { %s23_s22 = sshll.u32 %s468_s21, 4  ;;  %p397_p0 = scmp.ne.s32.totalorder %s568_s2, %s396_s25  ;;  %s24_s22 = int_to_ptr.vmem [resolvable:$true] %s23_s22 }
   0x4   :  { %p400_p1 = scmp.lt.u32.totalorder %s396_s25, %s568_s2 }
   0x6   :  { %p402_p2 = pnand %p400_p1, %p397_p0 }
   0x8   :  { %405 = shalt.err (!%p402_p2)
}
   0x9   :  { %s406_s30 = scalar_lea.vmem %s24_s22, 512  ;;  %p411_p4 = scmp.lt.s32.totalorder %s24_s22, %s24_s22 }
   0xa   :  { %p407_p3 = scmp.ne.s32.totalorder %s24_s22, %s406_s30  ;;  %p412_p5 = scmp.lt.s32.totalorder %s406_s30, %s406_s30 }
   0xc   :  { %p413_p6 = por %p412_p5, %p411_p4 }
   0xe   :  { %p414_p7 = pnand %p413_p6, %p407_p3 }
  0x10   :  { %417 = shalt.err (!%p414_p7)
}
  0x11   :  { %s469_s7 = smov 128   ;;  %s470_s8 = smov 8  }
  0x12   :  { %29 = dma.hbm_to_vmem [thread:$0]  %s568_s2, 512, %s24_s22, [#allocation3], %s469_s7, %s469_s7, %s470_s8  }
  0x13   :  { %s471_s11 = smov [#allocation5]   ;;  %s418_s15 = scalar_lea.hbm %s570_s4, 512 }
  0x14   :  { %s37_s12 = sshll.u32 %s471_s11, 4  ;;  %p419_p8 = scmp.ne.s32.totalorder %s570_s4, %s418_s15  ;;  %s38_s12 = int_to_ptr.vmem [resolvable:$true] %s37_s12 }
  0x15   :  { %p422_p9 = scmp.lt.u32.totalorder %s418_s15, %s570_s4 }
  0x17   :  { %p424_p10 = pnand %p422_p9, %p419_p8 }
  0x19   :  { %427 = shalt.err (!%p424_p10)
}
  0x1a   :  { %s428_s20 = scalar_lea.vmem %s38_s12, 512  ;;  %p433_p12 = scmp.lt.s32.totalorder %s38_s12, %s38_s12 }
  0x1b   :  { %p429_p11 = scmp.ne.s32.totalorder %s38_s12, %s428_s20  ;;  %p434_p13 = scmp.lt.s32.totalorder %s428_s20, %s428_s20 }
  0x1d   :  { %p435_p0 = por %p434_p13, %p433_p12 }
  0x1f   :  { %p436_p1 = pnand %p435_p0, %p429_p11 }
  0x21   :  { %439 = shalt.err (!%p436_p1)
}
  0x22   :  { %43 = dma.hbm_to_vmem [thread:$0]  %s570_s4, 512, %s38_s12, [#allocation6], %s469_s7, %s469_s7, %s470_s8  }
  0x23   :  { %462 = dma.done.wait [#allocation3], 512  }
  0x24   :  { %463 = vsyncadd [#allocation3], 4294966784 }
  0x25   :  { %464 = dma.done.wait [#allocation6], 512  }
  0x26   :  { %465 = vsyncadd [#allocation6], 4294966784  ;;  %v472_v0 = vmov 0   ;;  %v473_v1 = vmov 0.0   ;;  %v52_v2 = vld [vmem:[%s566_s0] sm:$0xff]  ;;  %vm66_vm0 = vcmask 1043456   ;;  %v53_v8 = vlaneseq }
  0x27   :  { %395 = vset.pattern.permute.xlu0 %v472_v0  ;;  %347 = vmatprep.subr.mxu0 %v473_v1  ;;  %v61_v3 = vld [vmem:[%s567_s1] sm:$0xf]  ;;  %vm474_vm1 = vmmov 0   ;;  %v142_v5 = vld [vmem:[#allocation2 + $0x8] sm:$0xff]  ;;  %v475_v6 = vmov 0.0|0.0   ;;  %vm62_vm2 = vcmask 31744  }
  0x28   :  { %56 = vperm.xlu0 %395, %v52_v2   ;;  %348 = vmatpush3.msk.msra.mxu0 %vm66_vm0, %v61_v3  ;;  %v141_v4 = vld [vmem:[#allocation2] sm:$0xff]  ;;  %v54_v9 = vand.u32 127, %v53_v8  ;;  %v143_v12 = vld [vmem:[#allocation2 + $0x10] sm:$0xff]  ;;  %v144_v13 = vld [vmem:[#allocation2 + $0x18] sm:$0xff]  ;;  %vm152_vm4 = vcmask 261120   ;;  %s476_s27 = smov [#allocation7]  }
  0x29   :  { %349 = vmatprep.mubr.msk.f32.mxu0 %vm474_vm1, %v473_v1  ;;  %360 = vmatprep.mubr.msk.f32.mxu1 %vm474_vm1, %v473_v1  ;;  %v375_v7 = vpack.c.bf16 %v142_v5, %v141_v4  ;;  %v378_v14 = vpack.c.bf16 %v144_v13, %v143_v12  ;;  %v227_v15 = vld [vmem:[#allocation5] sm:$0xff]  ;;  %v228_v16 = vld [vmem:[#allocation5 + $0x8] sm:$0xff]  ;;  %v229_v21 = vld [vmem:[#allocation5 + $0x10] sm:$0xff]  ;;  %s318_s28 = sshll.u32 %s476_s27, 4  ;;  %s319_s28 = int_to_ptr.vmem [resolvable:$true] %s318_s28 }
  0x2a   :  { %374 = vmatprep.subr.bf16.mxu1 %v475_v6  ;;  %380 = vmatprep.subr.bf16.mxu0 %v475_v6  ;;  %v381_v17 = vpack.c.bf16 %v228_v16, %v227_v15  ;;  %v230_v22 = vld [vmem:[#allocation5 + $0x18] sm:$0xff]  ;;  %v331_v24 = vld [vmem:[%s569_s3] ss:$0 sm:$0xff]  ;;  %s440_s29 = scalar_lea.vmem %s319_s28, 128  ;;  %p445_p3 = scmp.lt.s32.totalorder %s319_s28, %s319_s28 }
  0x2b   :  { %376 = vmatpush3.bf16.msra.mxu1 %v375_v7  ;;  %v384_v23 = vpack.c.bf16 %v230_v22, %v229_v21  ;;  %v333_v29 = vld [vmem:[%s571_s5] ss:$0 sm:$0xff]  ;;  %p441_p2 = scmp.ne.s32.totalorder %s319_s28, %s440_s29  ;;  %p446_p4 = scmp.lt.s32.totalorder %s440_s29, %s440_s29 }
  0x2c   :  { %377 = vmatprep.subr.bf16.mxu1 %v475_v6 }
  0x2d   :  { %p447_p5 = por %p446_p4, %p445_p3 }
  0x2f   :  { %379 = vmatpush3.bf16.msra.mxu1 %v378_v14  ;;  %p448_p6 = pnand %p447_p5, %p441_p2 }
  0xa7   :  { %v57_v10 = vpop.permute.xlu0 %56 }
  0xa8   :  { %vm58_vm3 = vcmp.eq.s32.totalorder %v54_v9, %v57_v10 }
  0xa9   :  { %v328_v11 = vsel %vm58_vm3, 1.0, %v473_v1 }
  0xaa   :  { %350 = vmatmul.mubr.msk.f32.vlgmr.msra.gmra.mrb[0].mxu0 %vm62_vm2, %v328_v11 }
  0xab   :  { %371 = vmatprep.mubr.msk.f32.mxu0 %vm474_vm1, %v473_v1  ;;  %382 = vmatpush3.bf16.msra.mxu0 %v381_v17 }
  0xac   :  { %383 = vmatprep.subr.bf16.mxu0 %v475_v6 }
  0xaf   :  { %385 = vmatpush3.bf16.msra.mxu0 %v384_v23 }
 0x17d   :  { %v136_v18 = vpop.f32.mrb[0].mxu0 }
 0x17e   :  { %v140_v19 = vmax.f32 %v136_v18, 0.0  ;;  %v351_v20 = vpop.f32.mrb[1].mxu0 }
 0x180   :  { %361 = vmatmul.mubr.msk.f32.vlgmr.msra.gmra.mrb[0].mxu1 %vm152_vm4, %v140_v19 }
 0x253   :  { %v222_v25 = vpop.f32.mrb[0].mxu1 }
 0x254   :  { %v223_v26 = vadd.f32 %v331_v24, %v222_v25  ;;  %v362_v27 = vpop.f32.mrb[1].mxu1 }
 0x256   :  { %v226_v28 = vmax.f32 %v223_v26, 0.0 }
 0x258   :  { %372 = vmatmul.mubr.msk.f32.vlgmr.msra.gmra.mrb[2].mxu0 %vm152_vm4, %v226_v28 }
 0x32b   :  { %v307_v30 = vpop.f32.mrb[2].mxu0 }
 0x32c   :  { %v308_v31 = vadd.f32 %v333_v29, %v307_v30  ;;  %v373_v32 = vpop.f32.mrb[3].mxu0 }
 0x32e   :  { %311 = vst.msk [vmem:[#allocation7] sm:$0xff] %vm152_vm4, %v308_v31 }
 0x32f   :  { %451 = shalt.err (!%p448_p6)
}
 0x330   :  { %s452_s7 = scalar_lea.hbm %s572_s6, 128 }
 0x331   :  { %p453_p7 = scmp.ne.s32.totalorder %s572_s6, %s452_s7  ;;  %p456_p8 = scmp.lt.u32.totalorder %s452_s7, %s572_s6 }
 0x333   :  { %p458_p9 = pnand %p456_p8, %p453_p7 }
 0x335   :  { %461 = shalt.err (!%p458_p9)
}
 0x336   :  { %321 = dma.vmem_to_hbm [thread:$0]  %s319_s28, 128, %s572_s6, [#allocation4]  }
 0x337   :  { %466 = dma.done.wait [#allocation4], 128  }
 0x338   :  { %467 = vsyncadd [#allocation4], 4294967168 }
 0x339   :  { %325 = vsyncpa [#allocation3], 1 }
 0x33a   :  { %326 = vsyncpa [#allocation6], 1 }
 0x33b   :  { %327 = vsyncpa [#allocation4], 1 }

</bundles_post_ra>
